<compile_context>
chip_gen: v7x
topology: tpu7x:2x2x1
jax: 0.10.0
libtpu: 0.0.40
codegen_flags: <defaults>
</compile_context>

<pallas_src>
import jax
import jax.numpy as jnp
from jax.experimental import pallas as pl
from jax.experimental.pallas import tpu as pltpu


# ----------------------------------------------------------------------------
# Kernel: fused 3-layer MLP (policy + value branches in one chain),
# writes a transposed, lane-dense-on-batch output slab.
# ----------------------------------------------------------------------------
def _fused_mlp_kernel(x_ref, w1_ref, b1_ref, w2_ref, b2_ref, w3_ref, b3_ref,
                      out_ref):
    x = x_ref[...]                                              # [tb, D]
    h1 = jnp.tanh(
        jnp.dot(x, w1_ref[...], preferred_element_type=jnp.float32)
        + b1_ref[...])                                          # [tb, 128]
    h2 = jnp.tanh(
        jnp.dot(h1, w2_ref[...], preferred_element_type=jnp.float32)
        + b2_ref[...])                                          # [tb, 128]
    out = (jnp.dot(h2, w3_ref[...], preferred_element_type=jnp.float32)
           + b3_ref[...])                                       # [tb, 128]
    out_t = out.T                                               # [128, tb] (XLU)
    out_ref[...] = out_t[:out_ref.shape[0], :]                  # [16, tb] store


# ----------------------------------------------------------------------------
# Host-side parameter fusion (done once, not per call).
#   W1f = [w1 | vw1 | 0]            : [D, HF]      (HF = 128-lane padded 2H)
#   W2f = block_diag(w2, vw2, 0)    : [HF, HF]
#   W3f = [w3 -> cols 0..A-1 ; vw3 -> col A ; 0]   : [HF, 128]
# All padding is exact zeros -> branches stay exactly independent.
# ----------------------------------------------------------------------------
def fuse_params(p, num_outputs):
    D, H = p["w1"].shape
    A = num_outputs
    assert A + 1 <= 128, "num_outputs > 127 needs a wider fused output"
    HF = max(128, ((2 * H + 127) // 128) * 128)      # fused hidden, lane-dense
    OUT_W = 128                                      # matmul output width
    OUT_SUB = max(8, ((A + 1 + 7) // 8) * 8)         # stored sublane rows (16)

    f32 = jnp.float32
    w1f = jnp.zeros((D, HF), f32)
    w1f = w1f.at[:, :H].set(p["w1"]).at[:, H:2 * H].set(p["vw1"])
    b1f = jnp.zeros((1, HF), f32)
    b1f = b1f.at[:, :H].set(p["b1"]).at[:, H:2 * H].set(p["vb1"])

    w2f = jnp.zeros((HF, HF), f32)
    w2f = w2f.at[:H, :H].set(p["w2"]).at[H:2 * H, H:2 * H].set(p["vw2"])
    b2f = jnp.zeros((1, HF), f32)
    b2f = b2f.at[:, :H].set(p["b2"]).at[:, H:2 * H].set(p["vb2"])

    w3f = jnp.zeros((HF, OUT_W), f32)
    w3f = w3f.at[:H, :A].set(p["w3"])                # logits from policy half
    w3f = w3f.at[H:2 * H, A:A + 1].set(p["vw3"])     # value  from value  half
    b3f = jnp.zeros((1, OUT_W), f32)
    b3f = b3f.at[:, :A].set(p["b3"]).at[:, A:A + 1].set(p["vb3"])

    return {"w1": w1f, "b1": b1f, "w2": w2f, "b2": b2f, "w3": w3f, "b3": b3f,
            "num_outputs": A, "out_sub": OUT_SUB}


# ----------------------------------------------------------------------------
# pallas_call wrappers.
# ----------------------------------------------------------------------------
_TILE_B_MIN = 256     # smallest batch tile (multiple of 128 for lane-dense store)
_TILE_B_MAX = 2048    # per review: 1024-2048; VMEM use stays < 1.5 MiB


def _pick_tile(B):
    # Guarantee >= 2 grid steps (v7x megacore) and a tile that's a
    # multiple of 256 (so the output store is lane-dense / unmasked).
    return min(_TILE_B_MAX, ((B // 2) // _TILE_B_MIN) * _TILE_B_MIN)


def _fused_forward_t(obs, fp):
    """Returns the transposed output slab [out_sub, B]."""
    B, D = obs.shape
    out_sub = fp["out_sub"]
    w_args = (fp["w1"], fp["b1"], fp["w2"], fp["b2"], fp["w3"], fp["b3"])

    if B >= 2 * _TILE_B_MIN:
        # Batch-tiled path: weights stay resident (constant block index ->
        # Pallas skips re-DMA per step), batch axis "parallel" so v7x shards
        # it across its 2 TensorCores.  cdiv grid handles ragged batches.
        tile = _pick_tile(B)
        grid = (pl.cdiv(B, tile),)

        def resident(shape):
            return pl.BlockSpec(shape, lambda i, _n=len(shape): (0,) * _n)

        return pl.pallas_call(
            _fused_mlp_kernel,
            out_shape=jax.ShapeDtypeStruct((out_sub, B), jnp.float32),
            grid=grid,
            in_specs=[pl.BlockSpec((tile, D), lambda i: (i, 0))]
                     + [resident(a.shape) for a in w_args],
            out_specs=pl.BlockSpec((out_sub, tile), lambda i: (0, i)),
            compiler_params=pltpu.CompilerParams(
                dimension_semantics=("parallel",)),
        )(obs, *w_args)

    # Small-batch path: no grid, whole-array VMEM blocks (no pipeline
    # bookkeeping).  Pad batch to a sublane multiple for clean layouts.
    Bp = ((B + 7) // 8) * 8
    obs_p = obs if Bp == B else jnp.pad(obs, ((0, Bp - B), (0, 0)))
    vmem = pl.BlockSpec(memory_space=pltpu.MemorySpace.VMEM)
    out = pl.pallas_call(
        _fused_mlp_kernel,
        out_shape=jax.ShapeDtypeStruct((out_sub, Bp), jnp.float32),
        in_specs=[vmem] * (1 + len(w_args)),
        out_specs=vmem,
    )(obs_p, *w_args)
    return out if Bp == B else out[:, :B]


def torch_fc_forward(obs, fp):
    """Returns (logits [B, A], value [B])."""
    A = fp["num_outputs"]
    out_t = _fused_forward_t(obs, fp)        # [out_sub, B]
    logits = out_t[:A, :].T                  # [B, A]   (tiny host-side transpose)
    value = out_t[A, :]                      # [B]
    return logits, value


# ----------------------------------------------------------------------------
# Parameter init (PyTorch nn.Linear style: U(-1/sqrt(fan_in), 1/sqrt(fan_in))).
# ----------------------------------------------------------------------------
def init_params(key, obs_dim, hidden, num_outputs):
    def linear(k, fan_in, fan_out):
        kw, kb = jax.random.split(k)
        bound = 1.0 / jnp.sqrt(jnp.float32(fan_in))
        w = jax.random.uniform(kw, (fan_in, fan_out), jnp.float32, -bound, bound)
        b = jax.random.uniform(kb, (1, fan_out), jnp.float32, -bound, bound)
        return w, b

    keys = jax.random.split(key, 6)
    p = {}
    p["w1"], p["b1"] = linear(keys[0], obs_dim, hidden)
    p["w2"], p["b2"] = linear(keys[1], hidden, hidden)
    p["w3"], p["b3"] = linear(keys[2], hidden, num_outputs)
    p["vw1"], p["vb1"] = linear(keys[3], obs_dim, hidden)
    p["vw2"], p["vb2"] = linear(keys[4], hidden, hidden)
    p["vw3"], p["vb3"] = linear(keys[5], hidden, 1)
    return p


# ----------------------------------------------------------------------------
# Model mirror of TorchModel: forward(input_dict, state, seq_lens) / value_function().
# ----------------------------------------------------------------------------
class PallasTorchModel:
    def __init__(self, obs_dim, num_outputs, hidden=32, seed=0):
        self.params = init_params(
            jax.random.PRNGKey(seed), obs_dim, hidden, num_outputs)
        self.fused = fuse_params(self.params, num_outputs)
        self._last_value = None

    def forward(self, input_dict, state, seq_lens):
        obs = input_dict["obs"]
        obs_flat = obs.reshape(obs.shape[0], -1).astype(jnp.float32)
        logits, value = torch_fc_forward(obs_flat, self.fused)
        self._last_value = value
        return logits, state

    def value_function(self):
        return self._last_value


# ----------------------------------------------------------------------------
# Pure-JAX reference (unfused weights) for correctness checking.
# ----------------------------------------------------------------------------
def _reference_forward(obs, p):
    h1 = jnp.tanh(obs @ p["w1"] + p["b1"])
    h2 = jnp.tanh(h1 @ p["w2"] + p["b2"])
    logits = h2 @ p["w3"] + p["b3"]
    v1 = jnp.tanh(obs @ p["vw1"] + p["vb1"])
    v2 = jnp.tanh(v1 @ p["vw2"] + p["vb2"])
    value = (v2 @ p["vw3"] + p["vb3"]).reshape(-1)
    return logits, value


if __name__ == "__main__":
    B, OBS_DIM, HIDDEN, NUM_OUTPUTS = 8, 32, 32, 8

    key = jax.random.PRNGKey(0)
    obs = jax.random.normal(key, (B, OBS_DIM), dtype=jnp.float32)

    model = PallasTorchModel(OBS_DIM, NUM_OUTPUTS, hidden=HIDDEN, seed=0)

    # --- small-batch (no-grid) path ------------------------------------------
    logits, state = model.forward({"obs": obs}, state=[], seq_lens=None)
    value = model.value_function()
    jax.block_until_ready((logits, value))

    assert logits.shape == (B, NUM_OUTPUTS)
    assert value.shape == (B,)
    ref_logits, ref_value = _reference_forward(obs, model.params)
    assert jnp.allclose(logits, ref_logits, atol=1e-4, rtol=1e-4)
    assert jnp.allclose(value, ref_value, atol=1e-4, rtol=1e-4)

    # --- batch-tiled ("parallel" grid) path, exact tile multiple -------------
    B_BIG = 2048
    obs_big = jax.random.normal(jax.random.PRNGKey(1), (B_BIG, OBS_DIM),
                                dtype=jnp.float32)
    logits_big, value_big = torch_fc_forward(obs_big, model.fused)
    jax.block_until_ready((logits_big, value_big))

    assert logits_big.shape == (B_BIG, NUM_OUTPUTS)
    assert value_big.shape == (B_BIG,)
    ref_lb, ref_vb = _reference_forward(obs_big, model.params)
    assert jnp.allclose(logits_big, ref_lb, atol=1e-4, rtol=1e-4)
    assert jnp.allclose(value_big, ref_vb, atol=1e-4, rtol=1e-4)

    # --- batch-tiled path, ragged batch (cdiv grid + masked partial block) ---
    B_RAG = 1000
    obs_rag = jax.random.normal(jax.random.PRNGKey(2), (B_RAG, OBS_DIM),
                                dtype=jnp.float32)
    logits_rag, value_rag = torch_fc_forward(obs_rag, model.fused)
    jax.block_until_ready((logits_rag, value_rag))

    assert logits_rag.shape == (B_RAG, NUM_OUTPUTS)
    assert value_rag.shape == (B_RAG,)
    ref_lr, ref_vr = _reference_forward(obs_rag, model.params)
    assert jnp.allclose(logits_rag, ref_lr, atol=1e-4, rtol=1e-4)
    assert jnp.allclose(value_rag, ref_vr, atol=1e-4, rtol=1e-4)

    print("KERNEL_OK")
</pallas_src>

<mosaic_0001>
module attributes {stable_mosaic.version = 11 : i64} {
  func.func @_fused_mlp_kernel(%arg0: memref<8x32xf32, #tpu.memory_space<vmem>>, %arg1: memref<32x128xf32, #tpu.memory_space<vmem>>, %arg2: memref<1x128xf32, #tpu.memory_space<vmem>>, %arg3: memref<128x128xf32, #tpu.memory_space<vmem>>, %arg4: memref<1x128xf32, #tpu.memory_space<vmem>>, %arg5: memref<128x128xf32, #tpu.memory_space<vmem>>, %arg6: memref<1x128xf32, #tpu.memory_space<vmem>>, %arg7: memref<16x8xf32, #tpu.memory_space<vmem>>) attributes {dimension_semantics = [], scalar_prefetch = 0 : i64, scratch_operands = 0 : i64, tpu.core_type = #tpu.core_type<tc>} {
    %c0 = arith.constant 0 : index
    %c0_0 = arith.constant 0 : index
    %0 = vector.load %arg0[%c0, %c0_0] : memref<8x32xf32, #tpu.memory_space<vmem>>, vector<8x32xf32>
    %c0_1 = arith.constant 0 : index
    %c0_2 = arith.constant 0 : index
    %1 = vector.load %arg1[%c0_1, %c0_2] : memref<32x128xf32, #tpu.memory_space<vmem>>, vector<32x128xf32>
    %cst = arith.constant dense<0.000000e+00> : vector<8x128xf32>
    %2 = tpu.matmul %0, %1, %cst {dimension_numbers = #tpu.dot_dimension_numbers<[1], [0], [0], [1], [0, 0, 1, 1], [], []>} : vector<8x32xf32>, vector<32x128xf32>, vector<8x128xf32> -> vector<8x128xf32>
    %c0_3 = arith.constant 0 : index
    %c0_4 = arith.constant 0 : index
    %3 = vector.load %arg2[%c0_3, %c0_4] : memref<1x128xf32, #tpu.memory_space<vmem>>, vector<1x128xf32>
    %4 = vector.broadcast %3 : vector<1x128xf32> to vector<8x128xf32>
    %5 = arith.addf %2, %4 : vector<8x128xf32>
    %6 = math.tanh %5 : vector<8x128xf32>
    %c0_5 = arith.constant 0 : index
    %c0_6 = arith.constant 0 : index
    %7 = vector.load %arg3[%c0_5, %c0_6] : memref<128x128xf32, #tpu.memory_space<vmem>>, vector<128x128xf32>
    %cst_7 = arith.constant dense<0.000000e+00> : vector<8x128xf32>
    %8 = tpu.matmul %6, %7, %cst_7 {dimension_numbers = #tpu.dot_dimension_numbers<[1], [0], [0], [1], [0, 0, 1, 1], [], []>} : vector<8x128xf32>, vector<128x128xf32>, vector<8x128xf32> -> vector<8x128xf32>
    %c0_8 = arith.constant 0 : index
    %c0_9 = arith.constant 0 : index
    %9 = vector.load %arg4[%c0_8, %c0_9] : memref<1x128xf32, #tpu.memory_space<vmem>>, vector<1x128xf32>
    %10 = vector.broadcast %9 : vector<1x128xf32> to vector<8x128xf32>
    %11 = arith.addf %8, %10 : vector<8x128xf32>
    %12 = math.tanh %11 : vector<8x128xf32>
    %c0_10 = arith.constant 0 : index
    %c0_11 = arith.constant 0 : index
    %13 = vector.load %arg5[%c0_10, %c0_11] : memref<128x128xf32, #tpu.memory_space<vmem>>, vector<128x128xf32>
    %cst_12 = arith.constant dense<0.000000e+00> : vector<8x128xf32>
    %14 = tpu.matmul %12, %13, %cst_12 {dimension_numbers = #tpu.dot_dimension_numbers<[1], [0], [0], [1], [0, 0, 1, 1], [], []>} : vector<8x128xf32>, vector<128x128xf32>, vector<8x128xf32> -> vector<8x128xf32>
    %c0_13 = arith.constant 0 : index
    %c0_14 = arith.constant 0 : index
    %15 = vector.load %arg6[%c0_13, %c0_14] : memref<1x128xf32, #tpu.memory_space<vmem>>, vector<1x128xf32>
    %16 = vector.broadcast %15 : vector<1x128xf32> to vector<8x128xf32>
    %17 = arith.addf %14, %16 : vector<8x128xf32>
    %18 = tpu.transpose %17, [1, 0] : vector<8x128xf32> -> vector<128x8xf32>
    %19 = vector.extract_strided_slice %18 {offsets = [0, 0], sizes = [16, 8], strides = [1, 1]} : vector<128x8xf32> to vector<16x8xf32>
    %c0_15 = arith.constant 0 : index
    %c0_16 = arith.constant 0 : index
    %20 = vector.load %arg7[%c0_15, %c0_16] : memref<16x8xf32, #tpu.memory_space<vmem>>, vector<16x8xf32>
    tpu.vector_store %arg7[%c0_15, %c0_16], %19 {strides = array<i32>} : memref<16x8xf32, #tpu.memory_space<vmem>>, vector<16x8xf32>,
    return
  }
}

</mosaic_0001>

<bundles_post_ra>
// kernel: tpu_custom_call.1
= control target key start
LH: loop header
LB: loop body
LE: loop exit
PB: predicated region body
PF: predicated region fallthrough
CT: control target
= control target key end

     0   :  { %12 = vsyncpa [#allocation3], 0  ;;  %s822_s0 = inlined_call_operand.hbm [shape: f32[8,32], index: 0, kind: input, shape index: {}]   ;;  %s823_s1 = inlined_call_operand.hbm [shape: f32[32,128], index: 1, kind: input, shape index: {}]   ;;  %s824_s2 = inlined_call_operand.vmem [shape: f32[1,128], index: 2, kind: input, shape index: {}]   ;;  %s825_s3 = inlined_call_operand.hbm [shape: f32[128,128], index: 3, kind: input, shape index: {}]   ;;  %s826_s4 = inlined_call_operand.vmem [shape: f32[1,128], index: 4, kind: input, shape index: {}]   ;;  %s827_s5 = inlined_call_operand.hbm [shape: f32[128,128], index: 5, kind: input, shape index: {}]   ;;  %s828_s6 = inlined_call_operand.vmem [shape: f32[1,128], index: 6, kind: input, shape index: {}]   ;;  %s829_s7 = inlined_call_operand.vmem [shape: f32[16,8], index: 7, kind: output, shape index: {}]  }
   0x1   :  { %13 = vsyncpa [#allocation5], 0 }
   0x2   :  { %14 = vsyncpa [#allocation8], 0  ;;  %s680_s24 = smov [#allocation4]   ;;  %s586_s28 = scalar_lea.hbm %s823_s1, 512 }
   0x3   :  { %s30_s25 = sshll.u32 %s680_s24, 4  ;;  %p587_p0 = scmp.ne.s32.totalorder %s823_s1, %s586_s28  ;;  %s31_s25 = int_to_ptr.vmem [resolvable:$true] %s30_s25 }
   0x4   :  { %p590_p1 = scmp.lt.u32.totalorder %s586_s28, %s823_s1 }
   0x6   :  { %p592_p2 = pnand %p590_p1, %p587_p0 }
   0x8   :  { %595 = shalt.err (!%p592_p2)
}
   0x9   :  { %s596_s10 = scalar_lea.vmem %s31_s25, 512  ;;  %p601_p4 = scmp.lt.s32.totalorder %s31_s25, %s31_s25 }
   0xa   :  { %p597_p3 = scmp.ne.s32.totalorder %s31_s25, %s596_s10  ;;  %p602_p5 = scmp.lt.s32.totalorder %s596_s10, %s596_s10 }
   0xc   :  { %p603_p6 = por %p602_p5, %p601_p4 }
   0xe   :  { %p604_p7 = pnand %p603_p6, %p597_p3 }
  0x10   :  { %607 = shalt.err (!%p604_p7)
}
  0x11   :  { %s681_s11 = smov 128   ;;  %s682_s12 = smov 8  }
  0x12   :  { %36 = dma.hbm_to_vmem [thread:$0]  %s823_s1, 512, %s31_s25, [#allocation5], %s681_s11, %s681_s11, %s682_s12  }
  0x13   :  { %s683_s15 = smov [#allocation2]   ;;  %s684_s17 = smov [#allocation6]  }
  0x14   :  { %s21_s16 = sshll.u32 %s683_s15, 4  ;;  %s44_s18 = sshll.u32 %s684_s17, 4  ;;  %s22_s16 = int_to_ptr.vmem [resolvable:$true] %s21_s16  ;;  %s45_s18 = int_to_ptr.vmem [resolvable:$true] %s44_s18 }
  0x15   :  { %s608_s21 = scalar_lea.hbm %s822_s0, 128 }
  0x16   :  { %p609_p8 = scmp.ne.s32.totalorder %s822_s0, %s608_s21  ;;  %p612_p9 = scmp.lt.u32.totalorder %s608_s21, %s822_s0 }
  0x18   :  { %p614_p10 = pnand %p612_p9, %p609_p8 }
  0x1a   :  { %617 = shalt.err (!%p614_p10)
}
  0x1b   :  { %s618_s1 = scalar_lea.vmem %s22_s16, 128  ;;  %p623_p12 = scmp.lt.s32.totalorder %s22_s16, %s22_s16 }
  0x1c   :  { %p619_p11 = scmp.ne.s32.totalorder %s22_s16, %s618_s1  ;;  %p624_p13 = scmp.lt.s32.totalorder %s618_s1, %s618_s1 }
  0x1e   :  { %p625_p0 = por %p624_p13, %p623_p12 }
  0x20   :  { %p626_p1 = pnand %p625_p0, %p619_p11 }
  0x22   :  { %629 = shalt.err (!%p626_p1)
}
  0x23   :  { %24 = dma.hbm_to_vmem [thread:$0]  %s822_s0, 128, %s22_s16, [#allocation3]  }
  0x24   :  { %s630_s30 = scalar_lea.hbm %s825_s3, 2048 }
  0x25   :  { %p631_p2 = scmp.ne.s32.totalorder %s825_s3, %s630_s30  ;;  %p634_p3 = scmp.lt.u32.totalorder %s630_s30, %s825_s3 }
  0x27   :  { %p636_p4 = pnand %p634_p3, %p631_p2 }
  0x29   :  { %639 = shalt.err (!%p636_p4)
}
  0x2a   :  { %s640_s14 = scalar_lea.vmem %s45_s18, 2048  ;;  %p645_p6 = scmp.lt.s32.totalorder %s45_s18, %s45_s18 }
  0x2b   :  { %p641_p5 = scmp.ne.s32.totalorder %s45_s18, %s640_s14  ;;  %p646_p7 = scmp.lt.s32.totalorder %s640_s14, %s640_s14 }
  0x2d   :  { %p647_p8 = por %p646_p7, %p645_p6 }
  0x2f   :  { %p648_p9 = pnand %p647_p8, %p641_p5 }
  0x31   :  { %651 = shalt.err (!%p648_p9)
}
  0x32   :  { %50 = dma.hbm_to_vmem [thread:$0]  %s825_s3, 2048, %s45_s18, [#allocation5], %s681_s11, %s681_s11, %s682_s12  }
  0x33   :  { %s685_s16 = smov [#allocation7]   ;;  %s652_s21 = scalar_lea.hbm %s827_s5, 2048 }
  0x34   :  { %s58_s17 = sshll.u32 %s685_s16, 4  ;;  %p653_p10 = scmp.ne.s32.totalorder %s827_s5, %s652_s21  ;;  %s59_s17 = int_to_ptr.vmem [resolvable:$true] %s58_s17 }
  0x35   :  { %p656_p11 = scmp.lt.u32.totalorder %s652_s21, %s827_s5 }
  0x37   :  { %p658_p12 = pnand %p656_p11, %p653_p10 }
  0x39   :  { %661 = shalt.err (!%p658_p12)
}
  0x3a   :  { %s662_s1 = scalar_lea.vmem %s59_s17, 2048  ;;  %p667_p0 = scmp.lt.s32.totalorder %s59_s17, %s59_s17 }
  0x3b   :  { %p663_p13 = scmp.ne.s32.totalorder %s59_s17, %s662_s1  ;;  %p668_p1 = scmp.lt.s32.totalorder %s662_s1, %s662_s1 }
  0x3d   :  { %p669_p2 = por %p668_p1, %p667_p0 }
  0x3f   :  { %p670_p3 = pnand %p669_p2, %p663_p13 }
  0x41   :  { %673 = shalt.err (!%p670_p3)
}
  0x42   :  { %64 = dma.hbm_to_vmem [thread:$0]  %s827_s5, 2048, %s59_s17, [#allocation8], %s681_s11, %s681_s11, %s682_s12  }
  0x43   :  { %674 = dma.done.wait [#allocation3], 128  }
  0x44   :  { %675 = vsyncadd [#allocation3], 4294967168 }
  0x45   :  { %676 = dma.done.wait [#allocation5], 2560  }
  0x46   :  { %677 = vsyncadd [#allocation5], 4294964736 }
  0x47   :  { %678 = dma.done.wait [#allocation8], 2048  }
  0x48   :  { %679 = vsyncadd [#allocation8], 4294965248  ;;  %v686_v0 = vmov 0.0|0.0   ;;  %vm687_vm0 = vmmov 0   ;;  %v688_v1 = vmov 0.0   ;;  %v80_v2 = vld [vmem:[#allocation4] sm:$0xff] }
  0x49   :  { %519 = vmatprep.subr.bf16.mxu0 %v686_v0  ;;  %446 = vmatprep.mubr.msk.f32.mxu0 %vm687_vm0, %v688_v1  ;;  %v81_v3 = vld [vmem:[#allocation4 + $0x8] sm:$0xff]  ;;  %v82_v4 = vld [vmem:[#allocation4 + $0x10] sm:$0xff]  ;;  %v83_v6 = vld [vmem:[#allocation4 + $0x18] sm:$0xff]  ;;  %vm91_vm1 = vcmask 261120   ;;  %vm385_vm2 = vcmask 64512  }
  0x4a   :  { %525 = vmatprep.subr.bf16.mxu1 %v686_v0  ;;  %481 = vmatprep.mubr.msk.f32.mxu1 %vm687_vm0, %v688_v1  ;;  %v520_v5 = vpack.c.bf16 %v81_v3, %v80_v2  ;;  %v166_v7 = vld [vmem:[#allocation6] sm:$0xff]  ;;  %v167_v8 = vld [vmem:[#allocation6 + $0x8] sm:$0xff]  ;;  %v168_v9 = vld [vmem:[#allocation6 + $0x10] sm:$0xff]  ;;  %v523_v11 = vpack.c.bf16 %v83_v6, %v82_v4 }
  0x4b   :  { %v169_v10 = vld [vmem:[#allocation6 + $0x18] sm:$0xff]  ;;  %v526_v12 = vpack.c.bf16 %v167_v8, %v166_v7  ;;  %v170_v14 = vld [vmem:[#allocation6 + $0x20] sm:$0xff]  ;;  %v171_v15 = vld [vmem:[#allocation6 + $0x28] sm:$0xff] }
  0x4c   :  { %521 = vmatpush3.bf16.msra.mxu0 %v520_v5  ;;  %v529_v13 = vpack.c.bf16 %v169_v10, %v168_v9  ;;  %v79_v16 = vld [vmem:[#allocation2] sm:$0xff]  ;;  %v532_v17 = vpack.c.bf16 %v171_v15, %v170_v14  ;;  %v172_v18 = vld [vmem:[#allocation6 + $0x30] sm:$0xff]  ;;  %v174_v21 = vld [vmem:[#allocation6 + $0x40] sm:$0xff] }
  0x4d   :  { %522 = vmatprep.subr.bf16.mxu0 %v686_v0  ;;  %527 = vmatpush3.bf16.msra.mxu1 %v526_v12  ;;  %v173_v19 = vld [vmem:[#allocation6 + $0x38] sm:$0xff]  ;;  %v175_v22 = vld [vmem:[#allocation6 + $0x48] sm:$0xff]  ;;  %v176_v24 = vld [vmem:[#allocation6 + $0x50] sm:$0xff] }
  0x4e   :  { %528 = vmatprep.subr.bf16.mxu1 %v686_v0  ;;  %v535_v20 = vpack.c.bf16 %v173_v19, %v172_v18  ;;  %v538_v23 = vpack.c.bf16 %v175_v22, %v174_v21  ;;  %v177_v25 = vld [vmem:[#allocation6 + $0x58] sm:$0xff]  ;;  %v178_v27 = vld [vmem:[#allocation6 + $0x60] sm:$0xff]  ;;  %v179_v28 = vld [vmem:[#allocation6 + $0x68] sm:$0xff] }
  0x4f   :  { %v541_v26 = vpack.c.bf16 %v177_v25, %v176_v24  ;;  %v544_v29 = vpack.c.bf16 %v179_v28, %v178_v27  ;;  %v180_v30 = vld [vmem:[#allocation6 + $0x70] sm:$0xff]  ;;  %v181_v31 = vld [vmem:[#allocation6 + $0x78] sm:$0xff]  ;;  %v260_v33 = vld [vmem:[#allocation7] sm:$0xff] }
  0x50   :  { %524 = vmatpush3.bf16.msra.mxu0 %v523_v11  ;;  %v547_v32 = vpack.c.bf16 %v181_v31, %v180_v30  ;;  %v261_v34 = vld [vmem:[#allocation7 + $0x8] sm:$0xff]  ;;  %v262_v35 = vld [vmem:[#allocation7 + $0x10] sm:$0xff]  ;;  %v263_v37 = vld [vmem:[#allocation7 + $0x18] sm:$0xff] }
  0x51   :  { %549 = vmatprep.subr.bf16.mxu0 %v686_v0  ;;  %530 = vmatpush3.bf16.msra.mxu1 %v529_v13  ;;  %v550_v36 = vpack.c.bf16 %v261_v34, %v260_v33  ;;  %v553_v38 = vpack.c.bf16 %v263_v37, %v262_v35  ;;  %v264_v39 = vld [vmem:[#allocation7 + $0x20] sm:$0xff]  ;;  %v265_v40 = vld [vmem:[#allocation7 + $0x28] sm:$0xff]  ;;  %v266_v42 = vld [vmem:[#allocation7 + $0x30] sm:$0xff] }
  0x52   :  { %531 = vmatprep.subr.bf16.mxu1 %v686_v0  ;;  %v556_v41 = vpack.c.bf16 %v265_v40, %v264_v39  ;;  %v267_v43 = vld [vmem:[#allocation7 + $0x38] sm:$0xff]  ;;  %v268_v45 = vld [vmem:[#allocation7 + $0x40] sm:$0xff]  ;;  %v269_v46 = vld [vmem:[#allocation7 + $0x48] sm:$0xff] }
  0x53   :  { %447 = vmatmul.mubr.msk.f32.vlgmr.msra.gmra.mrb[0].mxu0 %vm91_vm1, %v79_v16  ;;  %v559_v44 = vpack.c.bf16 %v267_v43, %v266_v42  ;;  %v562_v47 = vpack.c.bf16 %v269_v46, %v268_v45  ;;  %v395_v48 = vld [vmem:[%s824_s2] ss:$0 sm:$0xff]  ;;  %v270_v53 = vld [vmem:[#allocation7 + $0x50] sm:$0xff]  ;;  %v272_v56 = vld [vmem:[#allocation7 + $0x60] sm:$0xff] }
  0x54   :  { %516 = vmatprep.mubr.msk.f32.mxu0 %vm687_vm0, %v688_v1  ;;  %551 = vmatpush3.bf16.msra.mxu0 %v550_v36  ;;  %v271_v54 = vld [vmem:[#allocation7 + $0x58] sm:$0xff]  ;;  %v273_v57 = vld [vmem:[#allocation7 + $0x68] sm:$0xff]  ;;  %v274_v59 = vld [vmem:[#allocation7 + $0x70] sm:$0xff] }
  0x55   :  { %533 = vmatpush3.bf16.msra.mxu1 %v532_v17  ;;  %552 = vmatprep.subr.bf16.mxu0 %v686_v0  ;;  %v565_v55 = vpack.c.bf16 %v271_v54, %v270_v53  ;;  %v568_v58 = vpack.c.bf16 %v273_v57, %v272_v56  ;;  %v275_v60 = vld [vmem:[#allocation7 + $0x78] sm:$0xff] }
  0x56   :  { %534 = vmatprep.subr.bf16.mxu1 %v686_v0  ;;  %v571_v61 = vpack.c.bf16 %v275_v60, %v274_v59  ;;  %v397_v62 = vld [vmem:[%s826_s4] ss:$0 sm:$0xff] }
  0x57   :  { %v398_v4 = vld [vmem:[%s828_s6] ss:$0 sm:$0xff] }
  0x58   :  { %554 = vmatpush3.bf16.msra.mxu0 %v553_v38 }
  0x59   :  { %536 = vmatpush3.bf16.msra.mxu1 %v535_v20  ;;  %555 = vmatprep.subr.bf16.mxu0 %v686_v0 }
  0x5a   :  { %537 = vmatprep.subr.bf16.mxu1 %v686_v0 }
  0x5c   :  { %557 = vmatpush3.bf16.msra.mxu0 %v556_v41 }
  0x5d   :  { %539 = vmatpush3.bf16.msra.mxu1 %v538_v23  ;;  %558 = vmatprep.subr.bf16.mxu0 %v686_v0 }
  0x5e   :  { %540 = vmatprep.subr.bf16.mxu1 %v686_v0 }
  0x60   :  { %560 = vmatpush3.bf16.msra.mxu0 %v559_v44 }
  0x61   :  { %542 = vmatpush3.bf16.msra.mxu1 %v541_v26  ;;  %561 = vmatprep.subr.bf16.mxu0 %v686_v0 }
  0x62   :  { %543 = vmatprep.subr.bf16.mxu1 %v686_v0 }
  0x64   :  { %563 = vmatpush3.bf16.msra.mxu0 %v562_v47 }
  0x65   :  { %545 = vmatpush3.bf16.msra.mxu1 %v544_v29  ;;  %564 = vmatprep.subr.bf16.mxu0 %v686_v0 }
  0x66   :  { %546 = vmatprep.subr.bf16.mxu1 %v686_v0 }
  0x68   :  { %566 = vmatpush3.bf16.msra.mxu0 %v565_v55 }
  0x69   :  { %548 = vmatpush3.bf16.msra.mxu1 %v547_v32  ;;  %567 = vmatprep.subr.bf16.mxu0 %v686_v0 }
  0x6c   :  { %569 = vmatpush3.bf16.msra.mxu0 %v568_v58 }
  0x6d   :  { %570 = vmatprep.subr.bf16.mxu0 %v686_v0 }
  0x70   :  { %572 = vmatpush3.bf16.msra.mxu0 %v571_v61 }
 0x126   :  { %v161_v49 = vpop.f32.mrb[0].mxu0 }
 0x127   :  { %v162_v50 = vadd.f32 %v395_v48, %v161_v49  ;;  %v448_v51 = vpop.f32.mrb[1].mxu0 }
 0x129   :  { %582 = vtanh.f32 %v162_v50 }
 0x133   :  { %v583_v52 = vpop.eup %582 }
 0x134   :  { %482 = vmatmul.mubr.f32.vlgmr.msra.gmra.mrb[0].mxu1 %v583_v52 }
 0x207   :  { %v255_v63 = vpop.f32.mrb[0].mxu1 }
 0x208   :  { %v256_v1 = vadd.f32 %v397_v62, %v255_v63  ;;  %v483_v2 = vpop.f32.mrb[1].mxu1 }
 0x20a   :  { %584 = vtanh.f32 %v256_v1 }
 0x214   :  { %v585_v3 = vpop.eup %584 }
 0x215   :  { %517 = vmatmul.mubr.f32.vlgmr.msra.gmra.mrb[2].mxu0 %v585_v3 }
 0x2e8   :  { %v349_v5 = vpop.f32.mrb[2].mxu0 }
 0x2e9   :  { %v518_v6 = vpop.f32.mrb[3].mxu0  ;;  %v350_v7 = vadd.f32 %v398_v4, %v349_v5 }
 0x2eb   :  { %353 = vxpose.xlu0.b32.start.end [1/1] (short) (narrow) %v350_v7, 16 }
 0x36b   :  { %v369_v0 = vpop.trf.xlu0 }
 0x36c   :  { %386 = vst.msk [vmem:[%s829_s7] sm:$0xff] %vm385_vm2, %v369_v0 }
 0x36f   :  { %v370_v8 = vpop.trf.xlu0 }
 0x370   :  { %387 = vst.msk [vmem:[%s829_s7 + $0x8] sm:$0xff] %vm385_vm2, %v370_v8 }
 0x371   :  { %392 = vsyncpa [#allocation3], 1 }
 0x372   :  { %393 = vsyncpa [#allocation5], 1 }
 0x373   :  { %394 = vsyncpa [#allocation8], 1 }

</bundles_post_ra>
